<compile_context>
chip_gen: v5e
topology: v5e:2x2
jax: 0.10.0
libtpu: 0.0.40
codegen_flags: <defaults>
</compile_context>

<pallas_src>
import jax
import jax.numpy as jnp
from jax.experimental import pallas as pl
from jax.experimental.pallas import tpu as pltpu


# ---------------------------------------------------------------------------
# Kernels
# ---------------------------------------------------------------------------

def _gcn_layer1_kernel(a_ref, x_ref, w_ref, b_ref, h_ref, acc_ref):
    """h1 = relu(A_hat @ (x @ W1) + b1), K-tiled with resident f32 accumulator."""
    k = pl.program_id(1)

    @pl.when(k == 0)
    def _():
        acc_ref[...] = jnp.zeros_like(acc_ref)

    # Fused feature transform for this K tile: (tk, F_in) @ (F_in, H) on MXU.
    xw = jnp.dot(
        x_ref[...], w_ref[...], preferred_element_type=jnp.float32
    ).astype(jnp.bfloat16)
    # Aggregation: (tm, tk) @ (tk, H), f32 accumulation.
    acc_ref[...] += jnp.dot(a_ref[...], xw, preferred_element_type=jnp.float32)

    @pl.when(k == pl.num_programs(1) - 1)
    def _():
        h_ref[...] = jnp.maximum(acc_ref[...] + b_ref[...], 0.0).astype(h_ref.dtype)


def _gcn_layer2_head_kernel(a_ref, h1_ref, w_ref, b_ref, wd_ref, bd_ref,
                            out_ref, acc_ref):
    """out = log_softmax(relu(A_hat @ (h1 @ W2) + b2) @ W3 + b3).

    The 2-class head is folded into the finalize step as a softplus on the
    logit difference:
        diff   = h2 @ (w3[:,1] - w3[:,0]) + (b3[1] - b3[0])
        log p0 = -softplus(diff),   log p1 = -softplus(-diff)
    """
    k = pl.program_id(1)

    @pl.when(k == 0)
    def _():
        acc_ref[...] = jnp.zeros_like(acc_ref)

    xw = jnp.dot(
        h1_ref[...], w_ref[...], preferred_element_type=jnp.float32
    ).astype(jnp.bfloat16)
    acc_ref[...] += jnp.dot(a_ref[...], xw, preferred_element_type=jnp.float32)

    @pl.when(k == pl.num_programs(1) - 1)
    def _():
        h2 = jnp.maximum(acc_ref[...] + b_ref[...], 0.0)                # [tm, H]
        diff = jnp.sum(h2 * wd_ref[...], axis=-1, keepdims=True)        # [tm, 1]
        diff = diff + bd_ref[...]
        log1pe = jnp.log1p(jnp.exp(-jnp.abs(diff)))                     # shared
        lp0 = -(jnp.maximum(diff, 0.0) + log1pe)                        # log p(0)
        lp1 = -(jnp.maximum(-diff, 0.0) + log1pe)                       # log p(1)
        out_ref[...] = jnp.concatenate([lp0, lp1], axis=-1)


# ---------------------------------------------------------------------------
# Wrapper
# ---------------------------------------------------------------------------

_VMEM_LIMIT = 32 * 1024 * 1024   # well above actual use (~6 MiB), safe on v7x


def _round_up(v, m):
    return ((v + m - 1) // m) * m


def _choose_tiles(n):
    """Pick (tm, tk, n_pad): big tiles so per-step overhead stays hidden,
    with n_pad a multiple of both tm and tk."""
    if n >= 2048:
        tm = 512
    elif n >= 512:
        tm = 256
    else:
        tm = 128
    n_pad = _round_up(n, tm)
    tk = 128
    for cand in (2048, 1024, 512, 256, 128):
        if n_pad % cand == 0:
            tk = cand
            break
    return tm, tk, n_pad


def detector_forward(a_hat, x, params):
    """Detector forward (GCN variant).

    a_hat  : [N, N] float32 normalized adjacency (with self loops)
    x      : [N, F_in] float32 node features
    params : dict with w1 [F_in,H], b1 [1,H], w2 [H,H], b2 [1,H],
             w3 [H,2], b3 [1,2]
    returns: [N, 2] float32 log-probabilities
    """
    n, f_in = x.shape
    h_orig = params["w1"].shape[1]
    h_pad = _round_up(h_orig, 128)        # lane-dense hidden dim
    tm, tk, n_pad = _choose_tiles(n)

    # ---- pad / cast inputs (cast A to bf16 BEFORE padding) -----------------
    a_p = jnp.pad(a_hat.astype(jnp.bfloat16),
                  ((0, n_pad - n), (0, n_pad - n)))
    x_p = jnp.pad(x.astype(jnp.bfloat16), ((0, n_pad - n), (0, 0)))

    # ---- pad params to the lane-dense hidden width --------------------------
    w1 = jnp.pad(params["w1"], ((0, 0), (0, h_pad - h_orig))).astype(jnp.bfloat16)
    b1 = jnp.pad(params["b1"], ((0, 0), (0, h_pad - h_orig))).astype(jnp.float32)
    w2 = jnp.pad(params["w2"],
                 ((0, h_pad - h_orig), (0, h_pad - h_orig))).astype(jnp.bfloat16)
    b2 = jnp.pad(params["b2"], ((0, 0), (0, h_pad - h_orig))).astype(jnp.float32)

    wdiff = (params["w3"][:, 1] - params["w3"][:, 0]).reshape(1, h_orig)
    wdiff = jnp.pad(wdiff, ((0, 0), (0, h_pad - h_orig))).astype(jnp.float32)
    bdiff = (params["b3"][0, 1] - params["b3"][0, 0]).reshape(1, 1)
    bdiff = bdiff.astype(jnp.float32)

    grid = (n_pad // tm, n_pad // tk)
    dims = ("parallel", "arbitrary")

    # ---- layer 1: h1 = relu(A @ (x @ W1) + b1)  (transform fused) ----------
    h1 = pl.pallas_call(
        _gcn_layer1_kernel,
        out_shape=jax.ShapeDtypeStruct((n_pad, h_pad), jnp.bfloat16),
        grid=grid,
        in_specs=[
            pl.BlockSpec((tm, tk), lambda i, k: (i, k)),       # A_hat
            pl.BlockSpec((tk, f_in), lambda i, k: (k, 0)),     # x
            pl.BlockSpec((f_in, h_pad), lambda i, k: (0, 0)),  # W1
            pl.BlockSpec((1, h_pad), lambda i, k: (0, 0)),     # b1
        ],
        out_specs=pl.BlockSpec((tm, h_pad), lambda i, k: (i, 0)),
        scratch_shapes=[pltpu.VMEM((tm, h_pad), jnp.float32)],
        compiler_params=pltpu.CompilerParams(
            dimension_semantics=dims, vmem_limit_bytes=_VMEM_LIMIT),
    )(a_p, x_p, w1, b1)

    # ---- layer 2 + head: log_softmax(relu(A @ (h1 @ W2) + b2) @ W3 + b3) ---
    out_pad = pl.pallas_call(
        _gcn_layer2_head_kernel,
        out_shape=jax.ShapeDtypeStruct((n_pad, 2), jnp.float32),
        grid=grid,
        in_specs=[
            pl.BlockSpec((tm, tk), lambda i, k: (i, k)),        # A_hat
            pl.BlockSpec((tk, h_pad), lambda i, k: (k, 0)),     # h1
            pl.BlockSpec((h_pad, h_pad), lambda i, k: (0, 0)),  # W2
            pl.BlockSpec((1, h_pad), lambda i, k: (0, 0)),      # b2
            pl.BlockSpec((1, h_pad), lambda i, k: (0, 0)),      # wdiff
            pl.BlockSpec((1, 1), lambda i, k: (0, 0)),          # bdiff
        ],
        out_specs=pl.BlockSpec((tm, 2), lambda i, k: (i, 0)),
        scratch_shapes=[pltpu.VMEM((tm, h_pad), jnp.float32)],
        compiler_params=pltpu.CompilerParams(
            dimension_semantics=dims, vmem_limit_bytes=_VMEM_LIMIT),
    )(a_p, h1, w2, b2, wdiff, bdiff)

    return out_pad[:n]


# ---------------------------------------------------------------------------
# Graph / params helpers and pure-JAX reference
# ---------------------------------------------------------------------------

def build_normalized_adjacency(edge_index, num_nodes):
    """Dense A_hat = D^{-1/2} (A + I) D^{-1/2}, matching PyG GCNConv norm."""
    src, dst = edge_index[0], edge_index[1]
    a = jnp.zeros((num_nodes, num_nodes), jnp.float32)
    a = a.at[src, dst].set(1.0)
    a = a.at[jnp.arange(num_nodes), jnp.arange(num_nodes)].set(1.0)  # self loops
    deg = jnp.sum(a, axis=1)
    d_inv_sqrt = jnp.where(deg > 0, 1.0 / jnp.sqrt(deg), 0.0)
    return a * d_inv_sqrt[:, None] * d_inv_sqrt[None, :]


def init_params(key, input_dim, clf_dim, num_classes=2):
    k1, k2, k3 = jax.random.split(key, 3)
    scale1 = 1.0 / jnp.sqrt(input_dim)
    scale2 = 1.0 / jnp.sqrt(clf_dim)
    return {
        "w1": jax.random.normal(k1, (input_dim, clf_dim), jnp.float32) * scale1,
        "b1": jnp.zeros((1, clf_dim), jnp.float32),
        "w2": jax.random.normal(k2, (clf_dim, clf_dim), jnp.float32) * scale2,
        "b2": jnp.zeros((1, clf_dim), jnp.float32),
        "w3": jax.random.normal(k3, (clf_dim, num_classes), jnp.float32) * scale2,
        "b3": jnp.zeros((1, num_classes), jnp.float32),
    }


def reference_forward(a_hat, x, p):
    h1 = jnp.maximum(a_hat @ (x @ p["w1"]) + p["b1"], 0.0)
    h2 = jnp.maximum(a_hat @ (h1 @ p["w2"]) + p["b2"], 0.0)
    logits = h2 @ p["w3"] + p["b3"]
    return jax.nn.log_softmax(logits, axis=-1)


# ---------------------------------------------------------------------------
# Demo / self-test
# ---------------------------------------------------------------------------

if __name__ == "__main__":
    # N=200 deliberately not a tile multiple: exercises padding + a 2x2 grid.
    N, INPUT_DIM, CLF_DIM = 200, 16, 32

    key = jax.random.PRNGKey(0)
    kx, ke, kp = jax.random.split(key, 3)

    x = jax.random.normal(kx, (N, INPUT_DIM), jnp.float32)

    # Random undirected edges (symmetrized), no self loops.
    num_edges = 400
    src = jax.random.randint(ke, (num_edges,), 0, N)
    dst = (src + 1 + jax.random.randint(jax.random.fold_in(ke, 1),
                                        (num_edges,), 0, N - 1)) % N
    edge_index = jnp.stack(
        [jnp.concatenate([src, dst]), jnp.concatenate([dst, src])], axis=0)

    a_hat = build_normalized_adjacency(edge_index, N)
    params = init_params(kp, INPUT_DIM, CLF_DIM)

    out = detector_forward(a_hat, x, params)
    out = jax.block_until_ready(out)

    ref = reference_forward(a_hat, x, params)
    assert out.shape == (N, 2)
    # bf16 MXU inputs with f32 accumulation -> slightly looser tolerance vs
    # the pure-f32 reference.
    assert jnp.allclose(out, ref, atol=5e-2, rtol=5e-2), "mismatch vs JAX reference"

    print("KERNEL_OK")
</pallas_src>

<mosaic_0001>
module attributes {stable_mosaic.version = 11 : i64} {
  func.func @_gcn_layer1_kernel(%arg0: i32, %arg1: i32, %arg2: memref<128x256xbf16, #tpu.memory_space<vmem>>, %arg3: memref<256x16xbf16, #tpu.memory_space<vmem>>, %arg4: memref<16x128xbf16, #tpu.memory_space<vmem>>, %arg5: memref<1x128xf32, #tpu.memory_space<vmem>>, %arg6: memref<128x128xbf16, #tpu.memory_space<vmem>>, %arg7: memref<128x128xf32, #tpu.memory_space<vmem>>) attributes {dimension_semantics = [#tpu.dimension_semantics<parallel>, #tpu.dimension_semantics<arbitrary>], iteration_bounds = array<i64: 2, 1>, scalar_prefetch = 0 : i64, scratch_operands = 1 : i64, tpu.core_type = #tpu.core_type<tc>, window_params = [{transform_indices = @transform_0, window_bounds = array<i64: 128, 256>}, {transform_indices = @transform_1, window_bounds = array<i64: 256, 16>}, {pipeline_mode = #tpu.pipeline_mode<synchronous>, transform_indices = @transform_2, window_bounds = array<i64: 16, 128>}, {pipeline_mode = #tpu.pipeline_mode<synchronous>, transform_indices = @transform_3, window_bounds = array<i64: 1, 128>}, {transform_indices = @transform_4, window_bounds = array<i64: 128, 128>}]} {
    %c0_i32 = arith.constant 0 : i32
    %0 = arith.cmpi eq, %arg1, %c0_i32 : i32
    %1 = arith.extui %0 : i1 to i32
    %c0_i32_0 = arith.constant 0 : i32
    %2 = arith.cmpi ne, %1, %c0_i32_0 : i32
    scf.if %2 {
      %cst_13 = arith.constant 0.000000e+00 : f32
      %15 = vector.broadcast %cst_13 : f32 to vector<128x128xf32>
      %c0_14 = arith.constant 0 : index
      %c0_15 = arith.constant 0 : index
      %16 = vector.load %arg7[%c0_14, %c0_15] : memref<128x128xf32, #tpu.memory_space<vmem>>, vector<128x128xf32>
      tpu.vector_store %arg7[%c0_14, %c0_15], %15 {strides = array<i32>} : memref<128x128xf32, #tpu.memory_space<vmem>>, vector<128x128xf32>,
    } else {
    }
    %c0 = arith.constant 0 : index
    %c0_1 = arith.constant 0 : index
    %3 = vector.load %arg3[%c0, %c0_1] : memref<256x16xbf16, #tpu.memory_space<vmem>>, vector<256x16xbf16>
    %c0_2 = arith.constant 0 : index
    %c0_3 = arith.constant 0 : index
    %4 = vector.load %arg4[%c0_2, %c0_3] : memref<16x128xbf16, #tpu.memory_space<vmem>>, vector<16x128xbf16>
    %cst = arith.constant dense<0.000000e+00> : vector<256x128xf32>
    %5 = tpu.matmul %3, %4, %cst {dimension_numbers = #tpu.dot_dimension_numbers<[1], [0], [0], [1], [0, 0, 1, 1], [], []>} : vector<256x16xbf16>, vector<16x128xbf16>, vector<256x128xf32> -> vector<256x128xf32>
    %6 = arith.truncf %5 : vector<256x128xf32> to vector<256x128xbf16>
    %c0_4 = arith.constant 0 : index
    %c0_5 = arith.constant 0 : index
    %7 = vector.load %arg7[%c0_4, %c0_5] : memref<128x128xf32, #tpu.memory_space<vmem>>, vector<128x128xf32>
    %c0_6 = arith.constant 0 : index
    %c0_7 = arith.constant 0 : index
    %8 = vector.load %arg2[%c0_6, %c0_7] : memref<128x256xbf16, #tpu.memory_space<vmem>>, vector<128x256xbf16>
    %cst_8 = arith.constant dense<0.000000e+00> : vector<128x128xf32>
    %9 = tpu.matmul %8, %6, %cst_8 {dimension_numbers = #tpu.dot_dimension_numbers<[1], [0], [0], [1], [0, 0, 1, 1], [], []>} : vector<128x256xbf16>, vector<256x128xbf16>, vector<128x128xf32> -> vector<128x128xf32>
    %10 = arith.addf %7, %9 : vector<128x128xf32>
    %c0_9 = arith.constant 0 : index
    %c0_10 = arith.constant 0 : index
    %11 = vector.load %arg7[%c0_9, %c0_10] : memref<128x128xf32, #tpu.memory_space<vmem>>, vector<128x128xf32>
    tpu.vector_store %arg7[%c0_9, %c0_10], %10 {strides = array<i32>} : memref<128x128xf32, #tpu.memory_space<vmem>>, vector<128x128xf32>,
    %c0_i32_11 = arith.constant 0 : i32
    %12 = arith.cmpi eq, %arg1, %c0_i32_11 : i32
    %13 = arith.extui %12 : i1 to i32
    %c0_i32_12 = arith.constant 0 : i32
    %14 = arith.cmpi ne, %13, %c0_i32_12 : i32
    scf.if %14 {
      %c0_13 = arith.constant 0 : index
      %c0_14 = arith.constant 0 : index
      %15 = vector.load %arg7[%c0_13, %c0_14] : memref<128x128xf32, #tpu.memory_space<vmem>>, vector<128x128xf32>
      %c0_15 = arith.constant 0 : index
      %c0_16 = arith.constant 0 : index
      %16 = vector.load %arg5[%c0_15, %c0_16] : memref<1x128xf32, #tpu.memory_space<vmem>>, vector<1x128xf32>
      %17 = vector.broadcast %16 : vector<1x128xf32> to vector<128x128xf32>
      %18 = arith.addf %15, %17 : vector<128x128xf32>
      %cst_17 = arith.constant 0.000000e+00 : f32
      %19 = vector.broadcast %cst_17 : f32 to vector<128x128xf32>
      %20 = arith.maximumf %18, %19 : vector<128x128xf32>
      %21 = arith.truncf %20 : vector<128x128xf32> to vector<128x128xbf16>
      %c0_18 = arith.constant 0 : index
      %c0_19 = arith.constant 0 : index
      %22 = vector.load %arg6[%c0_18, %c0_19] : memref<128x128xbf16, #tpu.memory_space<vmem>>, vector<128x128xbf16>
      tpu.vector_store %arg6[%c0_18, %c0_19], %21 {strides = array<i32>} : memref<128x128xbf16, #tpu.memory_space<vmem>>, vector<128x128xbf16>,
    } else {
    }
    return
  }
  func.func @transform_0(%arg0: i32, %arg1: i32) -> (i32, i32) {
    %c0_i32 = arith.constant 0 : i32
    return %arg0, %arg1 : i32, i32
  }
  func.func @transform_1(%arg0: i32, %arg1: i32) -> (i32, i32) {
    %c0_i32 = arith.constant 0 : i32
    %c0_i32_0 = arith.constant 0 : i32
    return %arg1, %c0_i32 : i32, i32
  }
  func.func @transform_2(%arg0: i32, %arg1: i32) -> (i32, i32) {
    %c0_i32 = arith.constant 0 : i32
    %c0_i32_0 = arith.constant 0 : i32
    %c0_i32_1 = arith.constant 0 : i32
    return %c0_i32, %c0_i32_0 : i32, i32
  }
  func.func @transform_3(%arg0: i32, %arg1: i32) -> (i32, i32) {
    %c0_i32 = arith.constant 0 : i32
    %c0_i32_0 = arith.constant 0 : i32
    %c0_i32_1 = arith.constant 0 : i32
    return %c0_i32, %c0_i32_0 : i32, i32
  }
  func.func @transform_4(%arg0: i32, %arg1: i32) -> (i32, i32) {
    %c0_i32 = arith.constant 0 : i32
    %c0_i32_0 = arith.constant 0 : i32
    return %arg0, %c0_i32 : i32, i32
  }
}

</mosaic_0001>

<bundles_post_ra>
// kernel: tpu_custom_call.1
= control target key start
LH: loop header
LB: loop body
LE: loop exit
PB: predicated region body
PF: predicated region fallthrough
CT: control target
= control target key end

     0   :  { %9 = vsyncpa [#allocation4], 0  ;;  %s1721_s0 = inlined_call_operand.hbm [shape: bf16[256,256], index: 0, kind: input, shape index: {}]   ;;  %s1722_s1 = inlined_call_operand.vmem [shape: bf16[256,16], index: 1, kind: input, shape index: {}]   ;;  %s1723_s2 = inlined_call_operand.vmem [shape: bf16[16,128], index: 2, kind: input, shape index: {}]   ;;  %s1724_s3 = inlined_call_operand.vmem [shape: f32[1,128], index: 3, kind: input, shape index: {}]   ;;  %s1725_s4 = inlined_call_operand.hbm [shape: bf16[256,128], index: 4, kind: output, shape index: {}]  }
   0x1   :  { %11 = vsyncpa [#allocation4 + $0x1], 0 }
   0x2   :  { %12 = vsyncpa [#allocation5], 0 }
   0x3   :  { %14 = vsyncpa [#allocation5 + $0x1], 0  ;;  %s1458_s15 = smov 0   ;;  %s1460_s16 = smov 0  }
   0x4   :  { %s1462_s17 = smov 0   ;;  %s1464_s18 = smov 0  }
   0x5   :  { %s1466_s19 = smov 0   ;;  %s1468_s20 = smov 0  }
   0x6 LB: > { %s999_s21 = sadd.s32 4294967295, %s1427_s20   ;;  %s1000_s22 = sadd.s32 4294967294, %s1427_s20   ;;  %s1427_s20 = sphi %s1468_s20, %s20_s20   ;;  %s1423_s19 = sphi %s1466_s19, %s1734_s19   ;;  %s1419_s18 = sphi %s1464_s18, %s1733_s18   ;;  %s1415_s17 = sphi %s1462_s17, %s1732_s17   ;;  %s1411_s16 = sphi %s1460_s16, %s1731_s16   ;;  %s1407_s15 = sphi %s1458_s15, %s1730_s15  }
   0x7   : > { %s32_s23 = sadd.s32 1, %s1423_s19  ;;  %s41_s24 = sadd.s32 1, %s1415_s17 }
   0x8   : > { %p34_p0 = scmp.ge.s32.totalorder %s32_s23, 2  ;;  %p48_p1 = scmp.ne.s32.totalorder %s1415_s17, %s1411_s16 }
   0x9   : > { %p49_p2 = scmp.eq.s32.totalorder %s1427_s20, 0  ;;  %p54_p3 = scmp.ne.s32.totalorder %s1411_s16, %s1407_s15 }
   0xa   : > { %s1736_s23 = smov (%p34_p0, %s32_s23), 0  ;;  %p55_p5 = scmp.eq.s32.totalorder %s999_s21, 0 }
   0xb   : > { %p1499_p4 = por %p49_p2, %p48_p1  ;;  %s36_s26 = ssub.s32 %s1423_s19, %s1736_s23 }
   0xc   : > { %p146_p6 = scmp.eq.s32.totalorder %s999_s21, 1  ;;  %p39_p7 = scmp.eq.s32.totalorder %s36_s26, 0 }
   0xd   : > { %p1505_p8 = por %p55_p5, %p54_p3  ;;  %p152_p10 = scmp.eq.s32.totalorder %s1000_s22, 1 }
   0xe   : > { %p1509_p9 = por %p146_p6, %p48_p1  ;;  %p1003_p12 = scmp.ge.s32.totalorder %s1427_s20, 2 }
   0xf   : > { %s1514_s29 = scalar_select %p39_p7, %s1415_s17, %s41_s24  }
  0x10   : > { %p1516_p11 = por %p152_p10, %p54_p3  ;;  %p1260_p13 = scmp.lt.s32.totalorder %s1427_s20, 2 }
  0x11   : > { %s187_s5 = sand.u32 1, %s1415_s17   ;;  %s1165_s7 = sshll.u32 %s1423_s19, 7 }
  0x12   : > { %s1004_s6 = sshll.u32 %s187_s5, 7  ;;  %s199_s10 = scalar_lea.hbm %s1721_s0, %s1165_s7 }
  0x13   : > { %s191_s11 = scalar_lea.vmem [#allocation3], %s1004_s6  ;;  %s200_s13 = sshll.u32 %s199_s10, 4  ;;  %s201_s13 = int_to_ptr.hbm [resolvable:$true] %s200_s13 }
  0x14   : > { %s202_s12 = sshll.u32 %s191_s11, 4  ;;  %p1253_p0 = pnand %p1260_p13, %p1499_p4  ;;  %s203_s12 = int_to_ptr.vmem [resolvable:$true] %s202_s12 }
  0x15   : > { %p1008_p1 = scmp.ge.s32.totalorder %s1427_s20, 1  ;;  %s188_s14 = scalar_lea.sflag [#allocation4], %s187_s5 }
  0x16   : > { %s1429_s21 = smov 128   ;;  %s1430_s22 = smov 8  }
  0x17   : > { %1255 = dma.hbm_to_vmem [thread:$0]  (!%p1253_p0), %s201_s13, 2048, %s203_s12, %s188_s14, %s1429_s21, %s1429_s21, %s1430_s22  }
  0x18   : > { %p210_p2 = scmp.lt.s32.totalorder %s1427_s20, 3 }
  0x1a   : > { %p211_p3 = pnand %p1008_p1, %p210_p2 }
  0x1b   : > { %s1532_s24 = sand.u32 (!%p211_p3), 1, %s1411_s16  }
  0x1c   : > { %214 = sbr.rel (%p211_p3) target bundleno = 575 (0x23f), region = 36  ;;  %s1009_s26 = sshll.u32 (!%p211_p3), %s1532_s24, 7 }
  0x1d   : > { %s217_s6 = scalar_lea.sflag (!%p211_p3), [#allocation4], %s1532_s24  ;;  %s1536_s7 = scalar_lea.vmem (!%p211_p3), [#allocation3], %s1009_s26 }
  0x21   : > { %1398 = dma.done.wait (%p1505_p8), %s217_s6, 2048  }
  0x22   : > { %1400 = vsyncadd (%p1505_p8), %s217_s6, 4294965248  ;;  %v1182_v0 = vld [vmem:[%s1723_s2] sm:$0xff]  ;;  %v1175_v2 = vld [vmem:[%s1722_s1 + $0x48] sm:$0xff]  ;;  %vm401_vm0 = vcmask 130048   ;;  %s1010_s13 = sshll.u32 %s1532_s24, 6  ;;  %s1199_s14 = sshll.u32 %s1419_s18, 6 }
  0x23   : > { %v1166_v1 = vld [vmem:[%s1722_s1] sm:$0xff]  ;;  %457 = vmatpush.bf16.msra.mxu0 %v1182_v0  ;;  %1247 = vmatpush.bf16.msra.mxu3 %v1182_v0  ;;  %v1167_v3 = vld [vmem:[%s1722_s1 + $0x8] sm:$0xff]  ;;  %v1176_v4 = vld [vmem:[%s1722_s1 + $0x50] sm:$0xff]  ;;  %s896_s26 = scalar_lea.hbm %s1725_s4, %s1199_s14  ;;  %s885_s18 = scalar_lea.sflag [#allocation5], %s1532_s24 }
  0x24   : > { %v1168_v5 = vld [vmem:[%s1722_s1 + $0x10] sm:$0xff]  ;;  %v1177_v6 = vld [vmem:[%s1722_s1 + $0x58] sm:$0xff]  ;;  %v1178_v8 = vld [vmem:[%s1722_s1 + $0x60] sm:$0xff]  ;;  %s899_s25 = sshll.u32 %s896_s26, 4  ;;  %s1365_s11 = scalar_lea.hbm %s1725_s4, 128  ;;  %s900_s25 = int_to_ptr.hbm [resolvable:$true] %s899_s25 }
  0x25   : > { %v1169_v7 = vld [vmem:[%s1722_s1 + $0x18] sm:$0xff]  ;;  %v1170_v9 = vld [vmem:[%s1722_s1 + $0x20] sm:$0xff]  ;;  %v1179_v10 = vld [vmem:[%s1722_s1 + $0x68] sm:$0xff]  ;;  %s1359_s5 = sshra.s32 %s900_s25, 4  ;;  %s1360_s5 = int_to_ptr.hbm [resolvable:$true] %s1359_s5 }
  0x26   : > { %1079 = vmatmul.msk.bf16.vlgmr.msra.gmra.mxu0 %vm401_vm0, %v1166_v1  ;;  %1088 = vmatmul.msk.bf16.vlgmr.msra.gmra.mxu3 %vm401_vm0, %v1175_v2  ;;  %v1171_v11 = vld [vmem:[%s1722_s1 + $0x28] sm:$0xff]  ;;  %v1180_v12 = vld [vmem:[%s1722_s1 + $0x70] sm:$0xff]  ;;  %v1181_v14 = vld [vmem:[%s1722_s1 + $0x78] sm:$0xff]  ;;  %s1361_s8 = scalar_lea.hbm %s1360_s5, 64  ;;  %p1366_p7 = scmp.lt.s32.totalorder %s1360_s5, %s1725_s4 }
  0x27   : > { %v1172_v13 = vld [vmem:[%s1722_s1 + $0x30] sm:$0xff]  ;;  %v1173_v15 = vld [vmem:[%s1722_s1 + $0x38] sm:$0xff]  ;;  %v1174_v16 = vld [vmem:[%s1722_s1 + $0x40] sm:$0xff]  ;;  %p1362_p4 = scmp.ne.s32.totalorder %s1360_s5, %s1361_s8  ;;  %p1367_p8 = scmp.lt.s32.totalorder %s1365_s11, %s1361_s8 }
  0x28   : > { %v1183_v0 = vld [vmem:[%s1536_s7 + $0x4] sm:$0xf]  ;;  %v1099_v1 = vld [vmem:[%s1536_s7 + $0x8] sm:$0xf0] }
  0x29   : > { %p1363_p5 = pnand %p1362_p4, %p1509_p9  ;;  %p1368_p10 = por %p1367_p8, %p1366_p7 }
  0x2b   : > { %p1364_p6 = pneg %p1363_p5 }
  0x2d   : > { %p1369_p13 = pnand %p1368_p10, %p1364_p6 }
  0x36   : > { %1080 = vmatmul.msk.bf16.gmra.mxu0 %vm401_vm0, %v1167_v3  ;;  %1089 = vmatmul.msk.bf16.gmra.mxu3 %vm401_vm0, %v1176_v4  ;;  %v1102_v3 = vor.u32 %v1183_v0, %v1099_v1  ;;  %v1097_v4 = vld [vmem:[%s1536_s7] sm:$0xf] }
  0x46   : > { %1081 = vmatmul.msk.bf16.gmra.mxu0 %vm401_vm0, %v1168_v5  ;;  %1090 = vmatmul.msk.bf16.gmra.mxu3 %vm401_vm0, %v1177_v6  ;;  %v1184_v5 = vld [vmem:[%s1536_s7 + $0x4] sm:$0xf0] }
  0x47   : > { %v1098_v6 = vor.u32 %v1184_v5, %v1097_v4 }
  0x56   : > { %1082 = vmatmul.msk.bf16.gmra.mxu0 %vm401_vm0, %v1169_v7  ;;  %1091 = vmatmul.msk.bf16.gmra.mxu3 %vm401_vm0, %v1178_v8  ;;  %v1185_v7 = vld [vmem:[%s1536_s7 + $0x14] sm:$0xf]  ;;  %v1107_v8 = vld [vmem:[%s1536_s7 + $0x18] sm:$0xf0] }
  0x66   : > { %1083 = vmatmul.msk.bf16.gmra.mxu0 %vm401_vm0, %v1170_v9  ;;  %1092 = vmatmul.msk.bf16.gmra.mxu3 %vm401_vm0, %v1179_v10  ;;  %v1110_v9 = vor.u32 %v1185_v7, %v1107_v8  ;;  %v1105_v10 = vld [vmem:[%s1536_s7 + $0x10] sm:$0xf] }
  0x76   : > { %1084 = vmatmul.msk.bf16.gmra.mxu0 %vm401_vm0, %v1171_v11  ;;  %1093 = vmatmul.msk.bf16.gmra.mxu3 %vm401_vm0, %v1180_v12  ;;  %v1186_v11 = vld [vmem:[%s1536_s7 + $0x14] sm:$0xf0] }
  0x77   : > { %v1106_v12 = vor.u32 %v1186_v11, %v1105_v10 }
  0x86   : > { %1085 = vmatmul.msk.bf16.gmra.mxu0 %vm401_vm0, %v1172_v13  ;;  %1094 = vmatmul.msk.bf16.gmra.mxu3 %vm401_vm0, %v1181_v14  ;;  %v1187_v13 = vld [vmem:[%s1536_s7 + $0x24] sm:$0xf]  ;;  %v1115_v14 = vld [vmem:[%s1536_s7 + $0x28] sm:$0xf0] }
  0x96   : > { %1086 = vmatmul.msk.bf16.gmra.mxu0 %vm401_vm0, %v1173_v15  ;;  %v1118_v15 = vor.u32 %v1187_v13, %v1115_v14 }
  0xa3   : > { %v1608_v17 = vpop.f32.mrf.mxu0 }
  0xa6   : > { %1087 = vmatmul.msk.bf16.gmra.mxu0 %vm401_vm0, %v1174_v16  ;;  %v1113_v16 = vld [vmem:[%s1536_s7 + $0x20] sm:$0xf] }
  0xa9   : > { %v504_v18 = vpop.f32.mrf.mxu3 }
  0xab   : > { %v1611_v19 = vpop.f32.mrf.mxu0 }
  0xac   : > { %v539_v20 = vpack.c.bf16 %v1611_v19, %v1608_v17  ;;  %v1188_v17 = vld [vmem:[%s1536_s7 + $0x24] sm:$0xf0]  ;;  %v1189_v19 = vld [vmem:[%s1536_s7 + $0x34] sm:$0xf] }
  0xb1   : > { %v506_v21 = vpop.f32.mrf.mxu3 }
  0xb2   : > { %v548_v22 = vpack.c.bf16 %v506_v21, %v504_v18  ;;  %v1114_v18 = vor.u32 %v1188_v17, %v1113_v16 }
  0xb3   : > { %v464_v23 = vpop.f32.mrf.mxu0 }
  0xb9   : > { %v509_v24 = vpop.f32.mrf.mxu3 }
  0xbb   : > { %v466_v25 = vpop.f32.mrf.mxu0 }
  0xbc   : > { %v540_v26 = vpack.c.bf16 %v466_v25, %v464_v23  ;;  %v1190_v23 = vld [vmem:[%s1536_s7 + $0x34] sm:$0xf0]  ;;  %v1191_v25 = vld [vmem:[%s1536_s7 + $0x44] sm:$0xf] }
  0xc1   : > { %v511_v27 = vpop.f32.mrf.mxu3 }
  0xc2   : > { %v549_v28 = vpack.c.bf16 %v511_v27, %v509_v24 }
  0xc3   : > { %v469_v29 = vpop.f32.mrf.mxu0 }
  0xc9   : > { %v514_v30 = vpop.f32.mrf.mxu3 }
  0xcb   : > { %v471_v31 = vpop.f32.mrf.mxu0 }
  0xcc   : > { %v541_v32 = vpack.c.bf16 %v471_v31, %v469_v29  ;;  %v1192_v29 = vld [vmem:[%s1536_s7 + $0x44] sm:$0xf0]  ;;  %v1193_v31 = vld [vmem:[%s1536_s7 + $0x54] sm:$0xf] }
  0xd1   : > { %v516_v33 = vpop.f32.mrf.mxu3 }
  0xd2   : > { %v550_v34 = vpack.c.bf16 %v516_v33, %v514_v30 }
  0xd3   : > { %v474_v35 = vpop.f32.mrf.mxu0 }
  0xd9   : > { %v519_v36 = vpop.f32.mrf.mxu3 }
  0xdb   : > { %v476_v37 = vpop.f32.mrf.mxu0 }
  0xdc   : > { %v542_v38 = vpack.c.bf16 %v476_v37, %v474_v35  ;;  %v1194_v35 = vld [vmem:[%s1536_s7 + $0x54] sm:$0xf0]  ;;  %v1195_v37 = vld [vmem:[%s1536_s7 + $0x64] sm:$0xf] }
  0xe1   : > { %v521_v39 = vpop.f32.mrf.mxu3 }
  0xe2   : > { %v551_v58 = vpack.c.bf16 %v521_v39, %v519_v36 }
  0xe3   : > { %v479_v40 = vpop.f32.mrf.mxu0 }
  0xe9   : > { %v524_v41 = vpop.f32.mrf.mxu3 }
  0xeb   : > { %v481_v42 = vpop.f32.mrf.mxu0 }
  0xec   : > { %v543_v62 = vpack.c.bf16 %v481_v42, %v479_v40  ;;  %v1145_v40 = vld [vmem:[%s1536_s7 + $0x60] sm:$0xf] }
  0xf1   : > { %v526_v43 = vpop.f32.mrf.mxu3 }
  0xf2   : > { %v552_v55 = vpack.c.bf16 %v526_v43, %v524_v41  ;;  %v1196_v41 = vld [vmem:[%s1536_s7 + $0x64] sm:$0xf0]  ;;  %v1197_v43 = vld [vmem:[%s1536_s7 + $0x74] sm:$0xf] }
  0xf3   : > { %v484_v44 = vpop.f32.mrf.mxu0  ;;  %v1146_v42 = vor.u32 %v1196_v41, %v1145_v40 }
  0xf9   : > { %v529_v45 = vpop.f32.mrf.mxu3 }
  0xfb   : > { %v486_v46 = vpop.f32.mrf.mxu0 }
  0xfc   : > { %v544_v61 = vpack.c.bf16 %v486_v46, %v484_v44  ;;  %v1155_v44 = vld [vmem:[%s1536_s7 + $0x78] sm:$0xf0]  ;;  %v1153_v46 = vld [vmem:[%s1536_s7 + $0x70] sm:$0xf] }
 0x101   : > { %v531_v47 = vpop.f32.mrf.mxu3 }
 0x102   : > { %v553_v54 = vpack.c.bf16 %v531_v47, %v529_v45  ;;  %v1158_v45 = vor.u32 %v1197_v43, %v1155_v44  ;;  %v1198_v47 = vld [vmem:[%s1536_s7 + $0x74] sm:$0xf0] }
 0x103   : > { %v489_v48 = vpop.f32.mrf.mxu0 }
 0x109   : > { %v534_v49 = vpop.f32.mrf.mxu3 }
 0x10b   : > { %v491_v50 = vpop.f32.mrf.mxu0 }
 0x10c   : > { %v545_v59 = vpack.c.bf16 %v491_v50, %v489_v48  ;;  %v1154_v48 = vor.u32 %v1198_v47, %v1153_v46 }
 0x111   : > { %v536_v51 = vpop.f32.mrf.mxu3 }
 0x112   : > { %v554_v52 = vpack.c.bf16 %v536_v51, %v534_v49 }
 0x113   : > { %v494_v53 = vpop.f32.mrf.mxu0 }
 0x114   : > { %716 = vmatpush.bf16.msra.mxu2 %v554_v52 }
 0x118   : > { %717 = vmatpush.bf16.msra.mxu2 %v553_v54 }
 0x11b   : > { %v496_v56 = vpop.f32.mrf.mxu0 }
 0x11c   : > { %718 = vmatpush.bf16.msra.mxu2 %v552_v55  ;;  %v546_v57 = vpack.c.bf16 %v496_v56, %v494_v53  ;;  %v1653_v53 = vld [vmem:[%s1724_s3] ss:$0 sm:$0xff] }
 0x11e   : > { %667 = vmatpush.bf16.msra.mxu1 %v546_v57 }
 0x120   : > { %719 = vmatpush.bf16.msra.mxu2 %v551_v58 }
 0x122   : > { %668 = vmatpush.bf16.msra.mxu1 %v545_v59 }
 0x123   : > { %v499_v60 = vpop.f32.mrf.mxu0 }
 0x124   : > { %720 = vmatpush.bf16.msra.mxu2 %v550_v34  ;;  %v1137_v34 = vld [vmem:[%s1536_s7 + $0x50] sm:$0xf] }
 0x125   : > { %v1138_v36 = vor.u32 %v1194_v35, %v1137_v34 }
 0x126   : > { %669 = vmatpush.bf16.msra.mxu1 %v544_v61 }
 0x128   : > { %721 = vmatpush.bf16.msra.mxu2 %v549_v28  ;;  %v1129_v28 = vld [vmem:[%s1536_s7 + $0x40] sm:$0xf] }
 0x129   : > { %v1130_v30 = vor.u32 %v1192_v29, %v1129_v28 }
 0x12a   : > { %670 = vmatpush.bf16.msra.mxu1 %v543_v62 }
 0x12b   : > { %v501_v63 = vpop.f32.mrf.mxu0 }
 0x12c   : > { %722 = vmatpush.bf16.msra.mxu2 %v548_v22  ;;  %v547_v2 = vpack.c.bf16 %v501_v63, %v499_v60  ;;  %v1121_v22 = vld [vmem:[%s1536_s7 + $0x30] sm:$0xf] }
 0x12d   : > { %v1122_v24 = vor.u32 %v1190_v23, %v1121_v22 }
 0x12e   : > { %671 = vmatpush.bf16.msra.mxu1 %v542_v38  ;;  %v1147_v38 = vld [vmem:[%s1536_s7 + $0x68] sm:$0xf0] }
 0x12f   : > { %v1150_v39 = vor.u32 %v1195_v37, %v1147_v38 }
 0x130   : > { %723 = vmatpush.bf16.msra.mxu2 %v547_v2 }
 0x132   : > { %672 = vmatpush.bf16.msra.mxu1 %v541_v32  ;;  %v1139_v32 = vld [vmem:[%s1536_s7 + $0x58] sm:$0xf0] }
 0x133   : > { %724 = vmatmul.bf16.vlgmr.msra.gmra.mxu2 %v1102_v3  ;;  %v1142_v33 = vor.u32 %v1193_v31, %v1139_v32 }
 0x136   : > { %673 = vmatpush.bf16.msra.mxu1 %v540_v26  ;;  %v1131_v26 = vld [vmem:[%s1536_s7 + $0x48] sm:$0xf0] }
 0x137   : > { %v1134_v27 = vor.u32 %v1191_v25, %v1131_v26 }
 0x13a   : > { %674 = vmatpush.bf16.msra.mxu1 %v539_v20  ;;  %v1123_v20 = vld [vmem:[%s1536_s7 + $0x38] sm:$0xf0]  ;;  %s1658_s7 = scalar_lea.vmem [#allocation6], %s1010_s13 }
 0x13b   : > { %v1126_v21 = vor.u32 %v1189_v19, %v1123_v20  ;;  %s897_s6 = sshll.u32 %s1658_s7, 4  ;;  %s898_s6 = int_to_ptr.vmem [resolvable:$true] %s897_s6 }
 0x13d   : > { %675 = vmatmul.bf16.vlgmr.msra.gmra.mxu1 %v1098_v6 }
 0x143   : > { %729 = vmatmul.bf16.gmra.mxu2 %v1110_v9 }
 0x14d   : > { %680 = vmatmul.bf16.gmra.mxu1 %v1106_v12 }
 0x153   : > { %734 = vmatmul.bf16.gmra.mxu2 %v1118_v15 }
 0x15d   : > { %685 = vmatmul.bf16.gmra.mxu1 %v1114_v18 }
 0x163   : > { %739 = vmatmul.bf16.gmra.mxu2 %v1126_v21 }
 0x16d   : > { %690 = vmatmul.bf16.gmra.mxu1 %v1122_v24 }
 0x173   : > { %744 = vmatmul.bf16.gmra.mxu2 %v1134_v27 }
 0x17d   : > { %695 = vmatmul.bf16.gmra.mxu1 %v1130_v30 }
 0x183   : > { %749 = vmatmul.bf16.gmra.mxu2 %v1142_v33 }
 0x18d   : > { %700 = vmatmul.bf16.gmra.mxu1 %v1138_v36 }
 0x193   : > { %754 = vmatmul.bf16.gmra.mxu2 %v1150_v39 }
 0x19d   : > { %705 = vmatmul.bf16.gmra.mxu1 %v1146_v42 }
 0x1a3   : > { %759 = vmatmul.bf16.gmra.mxu2 %v1158_v45 }
 0x1ad   : > { %710 = vmatmul.bf16.gmra.mxu1 %v1154_v48 }
 0x1b6   : > { %v725_v49 = vpop.f32.mrf.mxu2 }
 0x1ba   : > { %v676_v50 = vpop.f32.mrf.mxu1 }
 0x1bb   : > { %v726_v52 = vadd.f32 %v725_v49, %v676_v50 }
 0x1bd   : > { %v820_v55 = vadd.f32 %v1653_v53, %v726_v52 }
 0x1be   : > { %v727_v51 = vpop.f32.mrf.mxu2 }
 0x1bf   : > { %v836_v59 = vmax.f32 %v820_v55, 0.0 }
 0x1c2   : > { %v678_v54 = vpop.f32.mrf.mxu1 }
 0x1c3   : > { %v728_v56 = vadd.f32 %v727_v51, %v678_v54 }
 0x1c5   : > { %v821_v57 = vadd.f32 %v1653_v53, %v728_v56 }
 0x1c6   : > { %v730_v58 = vpop.f32.mrf.mxu2 }
 0x1c7   : > { %v837_v60 = vmax.f32 %v821_v57, 0.0 }
 0x1c9   : > { %v1203_v61 = vpack.c.bf16 %v837_v60, %v836_v59 }
 0x1ca   : > { %v681_v62 = vpop.f32.mrf.mxu1 }
 0x1cb   : > { %1204 = vst [vmem:[%s1658_s7] sm:$0xff] %v1203_v61   ;;  %v731_v0 = vadd.f32 %v730_v58, %v681_v62 }
 0x1cd   : > { %v822_v2 = vadd.f32 %v1653_v53, %v731_v0 }
 0x1ce   : > { %v732_v63 = vpop.f32.mrf.mxu2 }
 0x1cf   : > { %v838_v6 = vmax.f32 %v822_v2, 0.0 }
 0x1d2   : > { %v683_v1 = vpop.f32.mrf.mxu1 }
 0x1d3   : > { %v733_v3 = vadd.f32 %v732_v63, %v683_v1 }
 0x1d5   : > { %v823_v4 = vadd.f32 %v1653_v53, %v733_v3 }
 0x1d6   : > { %v735_v5 = vpop.f32.mrf.mxu2 }
 0x1d7   : > { %v839_v7 = vmax.f32 %v823_v4, 0.0 }
 0x1d9   : > { %v1208_v8 = vpack.c.bf16 %v839_v7, %v838_v6 }
 0x1da   : > { %v686_v9 = vpop.f32.mrf.mxu1 }
 0x1db   : > { %1240 = vst [vmem:[%s1658_s7 + $0x8] sm:$0xff] %v1208_v8   ;;  %v736_v11 = vadd.f32 %v735_v5, %v686_v9 }
 0x1dd   : > { %v824_v13 = vadd.f32 %v1653_v53, %v736_v11 }
 0x1de   : > { %v737_v10 = vpop.f32.mrf.mxu2 }
 0x1df   : > { %v840_v17 = vmax.f32 %v824_v13, 0.0 }
 0x1e2   : > { %v688_v12 = vpop.f32.mrf.mxu1 }
 0x1e3   : > { %v738_v14 = vadd.f32 %v737_v10, %v688_v12 }
 0x1e5   : > { %v825_v15 = vadd.f32 %v1653_v53, %v738_v14 }
 0x1e6   : > { %v740_v16 = vpop.f32.mrf.mxu2 }
 0x1e7   : > { %v841_v18 = vmax.f32 %v825_v15, 0.0 }
 0x1e9   : > { %v1213_v19 = vpack.c.bf16 %v841_v18, %v840_v17 }
 0x1ea   : > { %v691_v20 = vpop.f32.mrf.mxu1 }
 0x1eb   : > { %1241 = vst [vmem:[%s1658_s7 + $0x10] sm:$0xff] %v1213_v19   ;;  %v741_v22 = vadd.f32 %v740_v16, %v691_v20 }
 0x1ed   : > { %v826_v24 = vadd.f32 %v1653_v53, %v741_v22 }
 0x1ee   : > { %v742_v21 = vpop.f32.mrf.mxu2 }
 0x1ef   : > { %v842_v28 = vmax.f32 %v826_v24, 0.0 }
 0x1f2   : > { %v693_v23 = vpop.f32.mrf.mxu1 }
 0x1f3   : > { %v743_v25 = vadd.f32 %v742_v21, %v693_v23 }
 0x1f5   : > { %v827_v26 = vadd.f32 %v1653_v53, %v743_v25 }
 0x1f6   : > { %v745_v27 = vpop.f32.mrf.mxu2 }
 0x1f7   : > { %v843_v29 = vmax.f32 %v827_v26, 0.0 }
 0x1f9   : > { %v1218_v30 = vpack.c.bf16 %v843_v29, %v842_v28 }
 0x1fa   : > { %v696_v31 = vpop.f32.mrf.mxu1 }
 0x1fb   : > { %1242 = vst [vmem:[%s1658_s7 + $0x18] sm:$0xff] %v1218_v30   ;;  %v746_v33 = vadd.f32 %v745_v27, %v696_v31 }
 0x1fd   : > { %v828_v35 = vadd.f32 %v1653_v53, %v746_v33 }
 0x1fe   : > { %v747_v32 = vpop.f32.mrf.mxu2 }
 0x1ff   : > { %v844_v39 = vmax.f32 %v828_v35, 0.0 }
 0x202   : > { %v698_v34 = vpop.f32.mrf.mxu1 }
 0x203   : > { %v748_v36 = vadd.f32 %v747_v32, %v698_v34 }
 0x205   : > { %v829_v37 = vadd.f32 %v1653_v53, %v748_v36 }
 0x206   : > { %v750_v38 = vpop.f32.mrf.mxu2 }
 0x207   : > { %v845_v40 = vmax.f32 %v829_v37, 0.0 }
 0x209   : > { %v1223_v41 = vpack.c.bf16 %v845_v40, %v844_v39 }
 0x20a   : > { %v701_v42 = vpop.f32.mrf.mxu1 }
 0x20b   : > { %1243 = vst [vmem:[%s1658_s7 + $0x20] sm:$0xff] %v1223_v41   ;;  %v751_v44 = vadd.f32 %v750_v38, %v701_v42 }
 0x20d   : > { %v830_v46 = vadd.f32 %v1653_v53, %v751_v44 }
 0x20e   : > { %v752_v43 = vpop.f32.mrf.mxu2 }
 0x20f   : > { %v846_v50 = vmax.f32 %v830_v46, 0.0 }
 0x212   : > { %v703_v45 = vpop.f32.mrf.mxu1 }
 0x213   : > { %v753_v47 = vadd.f32 %v752_v43, %v703_v45 }
 0x215   : > { %v831_v48 = vadd.f32 %v1653_v53, %v753_v47 }
 0x216   : > { %v755_v49 = vpop.f32.mrf.mxu2 }
 0x217   : > { %v847_v51 = vmax.f32 %v831_v48, 0.0 }
 0x219   : > { %v1228_v52 = vpack.c.bf16 %v847_v51, %v846_v50 }
 0x21a   : > { %v706_v54 = vpop.f32.mrf.mxu1 }
 0x21b   : > { %1244 = vst [vmem:[%s1658_s7 + $0x28] sm:$0xff] %v1228_v52   ;;  %v756_v56 = vadd.f32 %v755_v49, %v706_v54 }
 0x21d   : > { %v832_v58 = vadd.f32 %v1653_v53, %v756_v56 }
 0x21e   : > { %v757_v55 = vpop.f32.mrf.mxu2 }
 0x21f   : > { %v848_v61 = vmax.f32 %v832_v58, 0.0 }
 0x222   : > { %v708_v57 = vpop.f32.mrf.mxu1 }
 0x223   : > { %v758_v59 = vadd.f32 %v757_v55, %v708_v57 }
 0x225   : > { %v833_v60 = vadd.f32 %v1653_v53, %v758_v59 }
 0x226   : > { %v760_v63 = vpop.f32.mrf.mxu2 }
 0x227   : > { %v849_v62 = vmax.f32 %v833_v60, 0.0 }
 0x229   : > { %v1233_v0 = vpack.c.bf16 %v849_v62, %v848_v61 }
 0x22a   : > { %v711_v1 = vpop.f32.mrf.mxu1 }
 0x22b   : > { %1245 = vst [vmem:[%s1658_s7 + $0x30] sm:$0xff] %v1233_v0   ;;  %v761_v2 = vadd.f32 %v760_v63, %v711_v1 }
 0x22d   : > { %v834_v5 = vadd.f32 %v1653_v53, %v761_v2 }
 0x22e   : > { %v762_v3 = vpop.f32.mrf.mxu2 }
 0x22f   : > { %v850_v8 = vmax.f32 %v834_v5, 0.0 }
 0x232   : > { %v713_v4 = vpop.f32.mrf.mxu1 }
 0x233   : > { %v763_v6 = vadd.f32 %v762_v3, %v713_v4 }
 0x235   : > { %v835_v7 = vadd.f32 %v1653_v53, %v763_v6 }
 0x237   : > { %v851_v9 = vmax.f32 %v835_v7, 0.0 }
 0x239   : > { %v1238_v10 = vpack.c.bf16 %v851_v9, %v850_v8 }
 0x23b   : > { %1246 = vst [vmem:[%s1658_s7 + $0x38] sm:$0xff] %v1238_v10  }
 0x23c   : > { %1372 = shalt.err (!%p1369_p13)
}
 0x23d   : > { %s1431_s24 = smov 64   ;;  %s1432_s13 = smov 4  }
 0x23e   : > { %1250 = dma.vmem_to_hbm [thread:$0]  (%p1509_p9), %s898_s6, 1024, %s900_s25, %s885_s18, %s1431_s24, %s1431_s24, %s1432_s13  }
 0x23f PF: > { %s914_s7 = sand.u32 1, %s1407_s15   ;;  %p1257_p0 = pnand %p1003_p12, %p1516_p11 }
 0x240   : > { %s915_s14 = scalar_lea.sflag [#allocation5], %s914_s7 }
 0x241   : > { %p1258_p1 = pneg %p1257_p0 }
 0x243   : > { %1402 = dma.done.wait (%p1258_p1), %s915_s14, 1024  }
 0x244   : > { %1404 = vsyncadd (%p1258_p1), %s915_s14, 4294966272  ;;  %s20_s20 = sadd.s32 1, %s1427_s20   ;;  %s1730_s15 = smov %s1411_s16 }
 0x245   : > { %p17_p2 = scmp.ge.s32.totalorder %s20_s20, 4   ;;  %s1731_s16 = smov %s1415_s17 }
 0x246   : > { %s1732_s17 = smov %s1514_s29  ;;  %s1733_s18 = smov %s1423_s19 }
 0x247   : > { %s1734_s19 = smov %s1736_s23  ;;  %19 = sbr.rel (!%p17_p2) target bundleno = 6 (0x6), region = 92 }
 0x24c   :  { %921 = vsyncpa [#allocation4], 1 }
 0x24d   :  { %923 = vsyncpa [#allocation4 + $0x1], 1 }
 0x24e   :  { %924 = vsyncpa [#allocation5], 1 }
 0x24f   :  { %926 = vsyncpa [#allocation5 + $0x1], 1 }

</bundles_post_ra>
